<compile_context>
chip_gen: v6e
topology: v6e:2x2x1
jax: 0.10.0
libtpu: 0.0.40
codegen_flags: <defaults>
</compile_context>

<pallas_src>
import functools

import jax
import jax.numpy as jnp
from jax.experimental import pallas as pl
from jax.experimental.pallas import tpu as pltpu


# ----------------------------------------------------------------------------- helpers


def _accum_static(x_ref, psum, pmax, k0, n, acc_w):
    """Python-unrolled accumulation of n full chunks [k0, k0+n) with static slices."""
    for k in range(k0, k0 + n):
        c = x_ref[:, k * acc_w:(k + 1) * acc_w].astype(jnp.float32)
        psum = psum + c
        pmax = jnp.maximum(pmax, c)
    return psum, pmax


def _accum_chunks(x_ref, psum, pmax, n, acc_w):
    """Accumulate n full lane-aligned chunks starting at spatial offset 0 (unmasked)."""
    if n <= 0:
        return psum, pmax
    if n <= 8:
        return _accum_static(x_ref, psum, pmax, 0, n, acc_w)

    n_main = (n // 8) * 8

    def body(k, carry):
        ps, pm = carry
        off = pl.multiple_of(k * acc_w, acc_w)
        c = x_ref[:, pl.ds(off, acc_w)].astype(jnp.float32)
        return ps + c, jnp.maximum(pm, c)

    psum, pmax = jax.lax.fori_loop(0, n_main, body, (psum, pmax), unroll=8)
    # statically peeled remainder (< 8 chunks)
    return _accum_static(x_ref, psum, pmax, n_main, n - n_main, acc_w)


# ----------------------------------------------------------------------------- kernels


def pool_reduce_kernel(x_ref, p_ref, sum_acc, max_acc, *, hw, thw, acc_w, rem):
    # x_ref   : (C_blk, thw)   one (batch, channel-block) x one spatial tile
    # p_ref   : (C_blk, 2)     column 0 = avg, column 1 = max  (f32)
    # sum_acc : (C_blk, acc_w) f32 running sum  (persists across the spatial grid axis)
    # max_acc : (C_blk, acc_w) f32 running max
    s = pl.program_id(2)
    n_s = pl.num_programs(2)

    @pl.when(s == 0)
    def _init():
        sum_acc[...] = jnp.zeros_like(sum_acc)
        max_acc[...] = jnp.full_like(max_acc, -jnp.inf)

    n_chunks = thw // acc_w            # full chunks in a regular tile
    n_full_last = rem // acc_w         # full (valid) chunks in the last tile
    tail = rem - n_full_last * acc_w   # ragged lanes in the last tile's partial chunk
    ragged = (n_full_last != n_chunks) or (tail > 0)

    def run_full(n):
        psum, pmax = _accum_chunks(x_ref, sum_acc[...], max_acc[...], n, acc_w)
        sum_acc[...] = psum
        max_acc[...] = pmax

    if not ragged:
        # Steady state: unmasked add/max only.
        run_full(n_chunks)
    else:
        # Masking is gated to the last spatial step and the single partial chunk.
        @pl.when(s < n_s - 1)
        def _regular():
            run_full(n_chunks)

        @pl.when(s == n_s - 1)
        def _last():
            psum, pmax = _accum_chunks(x_ref, sum_acc[...], max_acc[...],
                                       n_full_last, acc_w)
            if tail > 0:
                off = n_full_last * acc_w          # static offset of the partial chunk
                c = x_ref[:, off:off + acc_w].astype(jnp.float32)
                lane = jax.lax.broadcasted_iota(jnp.int32, c.shape, 1)
                valid = lane < tail
                psum = psum + jnp.where(valid, c, 0.0)
                pmax = jnp.maximum(pmax, jnp.where(valid, c, -jnp.inf))
            sum_acc[...] = psum
            max_acc[...] = pmax

    @pl.when(s == n_s - 1)
    def _finalize():
        # Single cross-lane reduce (XLU) once per (batch, channel-block).
        avg = jnp.sum(sum_acc[...], axis=-1, keepdims=True) * (1.0 / hw)   # (C_blk, 1)
        mx = jnp.max(max_acc[...], axis=-1, keepdims=True)                 # (C_blk, 1)
        col = jax.lax.broadcasted_iota(jnp.int32, (sum_acc.shape[0], 2), 1)
        p_ref[...] = jnp.where(col == 0, avg, mx).astype(p_ref.dtype)      # (C_blk, 2)


def mlp_kernel(p_ref, w1_ref, w2_ref, o_ref):
    # p_ref : (C, 2)   [avg | max] columns for one batch element
    # w1    : (Cr, C)  Conv2d(C -> Cr, 1x1) weight, squeezed
    # w2    : (C, Cr)  Conv2d(Cr -> C, 1x1) weight, squeezed
    # o_ref : (C, 1)   sigmoid(fc(avg) + fc(max))
    p = p_ref[...].astype(jnp.float32)
    w1 = w1_ref[...].astype(jnp.float32)
    w2 = w2_ref[...].astype(jnp.float32)
    h = jnp.maximum(jnp.dot(w1, p, preferred_element_type=jnp.float32), 0.0)   # (Cr, 2)
    y = jnp.dot(w2, h, preferred_element_type=jnp.float32)                     # (C, 2)
    ysum = jnp.sum(y, axis=-1, keepdims=True)                                  # (C, 1)
    o_ref[...] = (1.0 / (1.0 + jnp.exp(-ysum))).astype(o_ref.dtype)


# ---------------------------------------------------------------------- sizing heuristics


def _vmem_capacity_bytes():
    try:
        cap = getattr(pltpu.get_tpu_info(), "vmem_capacity_bytes", None)
        if cap:
            return int(cap)
    except Exception:
        pass
    try:
        kind = jax.devices()[0].device_kind.lower()
    except Exception:
        kind = ""
    if "v7" in kind:
        return 64 * 1024 * 1024
    return 128 * 1024 * 1024        # v5e / v6e / unknown: 128 MiB physical


def _default_vmem_limit():
    cap = _vmem_capacity_bytes()
    if cap <= 64 * 1024 * 1024:
        # v7x-class (64 MiB physical): ~46 MiB scoped, leave headroom.
        return min(int(cap * 0.72), cap - (8 << 20))
    # v5e / v6e (128 MiB physical): 64 MiB scoped limit is plenty.
    return 64 * 1024 * 1024


def _choose_channel_block(c):
    """Channel sub-block so accumulators stay in <= ~32 vregs (avoids spills at large C)."""
    if c <= 128:
        return c
    if c % 128 == 0:
        return 128
    for cb in range(128, 7, -8):        # largest multiple-of-8 divisor <= 128
        if c % cb == 0:
            return cb
    return c                            # unfriendly C: single block (correct, may spill)


def _choose_spatial_tile(hw, c_blk, elt_bytes, block_budget_bytes):
    """Largest lane-aligned spatial tile whose (C_blk, tile) block fits the budget."""
    lane = 128
    max_lanes = (block_budget_bytes // max(1, c_blk * elt_bytes)) // lane * lane
    max_lanes = max(lane, max_lanes)
    if hw <= max_lanes:
        return hw                       # whole spatial extent in one tile
    best = 0
    if hw % lane == 0:
        n = hw // lane
        for d in range(1, n + 1):
            if n % d == 0 and d * lane <= max_lanes:
                best = d * lane
    # Only prefer an exact divisor (no masked tail) if it is within ~2x of the budgeted
    # tile; otherwise take the max tile and pay one cheap, gated masked tail chunk.
    if best > 0 and best * 2 >= max_lanes:
        return best
    return max_lanes


# ----------------------------------------------------------------------------- wrapper


def channel_attention(x, w1, w2, *, spatial_tile=None, channel_block=None,
                      vmem_limit_bytes=None):
    """x: (B, C, H, W) NCHW.  w1: (Cr, C).  w2: (C, Cr).  Returns (B, C, 1, 1)."""
    B, C, H, W = x.shape
    Cr = w1.shape[0]
    assert w1.shape == (Cr, C) and w2.shape == (C, Cr)

    HW = H * W
    x_flat = x.reshape(B, C, HW)
    elt = x_flat.dtype.itemsize

    if vmem_limit_bytes is None:
        vmem_limit_bytes = _default_vmem_limit()
    vmem_limit_bytes = int(vmem_limit_bytes)

    if channel_block is None:
        c_blk = _choose_channel_block(C)
    else:
        c_blk = int(channel_block)
        assert C % c_blk == 0 and (c_blk == C or c_blk % 8 == 0)
    n_cb = C // c_blk

    if spatial_tile is None:
        # ~1/3 of the scoped limit per x block (double-buffered + scratch fits easily).
        block_budget = max(128 * c_blk * elt, vmem_limit_bytes // 3 - (1 << 20))
        thw = _choose_spatial_tile(HW, c_blk, elt, block_budget)
    else:
        thw = int(spatial_tile)
        if thw >= HW:
            thw = HW
        else:
            thw = max(128, ((thw + 127) // 128) * 128)   # keep lane-aligned
            thw = min(thw, ((HW + 127) // 128) * 128)
            if thw >= HW:
                thw = HW

    n_s = pl.cdiv(HW, thw)
    rem = HW - (n_s - 1) * thw                     # valid spatial extent of last tile
    acc_w = 128 if thw % 128 == 0 else thw         # lane width of accumulator chunks

    reduce_kernel = functools.partial(
        pool_reduce_kernel, hw=HW, thw=thw, acc_w=acc_w, rem=rem)

    # Stage 1: streamed avg/max pooling (HBM-read bound).
    pooled = pl.pallas_call(
        reduce_kernel,
        out_shape=jax.ShapeDtypeStruct((B, C, 2), jnp.float32),
        grid=(B, n_cb, n_s),
        in_specs=[pl.BlockSpec((None, c_blk, thw), lambda b, c, s: (b, c, s))],
        out_specs=pl.BlockSpec((None, c_blk, 2), lambda b, c, s: (b, c, 0)),
        scratch_shapes=[
            pltpu.VMEM((c_blk, acc_w), jnp.float32),   # running sum
            pltpu.VMEM((c_blk, acc_w), jnp.float32),   # running max
        ],
        compiler_params=pltpu.CompilerParams(
            dimension_semantics=("parallel", "parallel", "arbitrary"),
            vmem_limit_bytes=vmem_limit_bytes,
        ),
        cost_estimate=pl.CostEstimate(
            flops=int(2 * B * C * HW),
            transcendentals=0,
            bytes_accessed=int(x_flat.size * elt + B * C * 2 * 4)),
    )(x_flat)

    # Stage 2: tiny shared-MLP + sigmoid per batch element.
    attn = pl.pallas_call(
        mlp_kernel,
        out_shape=jax.ShapeDtypeStruct((B, C, 1), x.dtype),
        grid=(B,),
        in_specs=[
            pl.BlockSpec((None, C, 2), lambda b: (b, 0, 0)),
            pl.BlockSpec((Cr, C), lambda b: (0, 0)),
            pl.BlockSpec((C, Cr), lambda b: (0, 0)),
        ],
        out_specs=pl.BlockSpec((None, C, 1), lambda b: (b, 0, 0)),
        compiler_params=pltpu.CompilerParams(
            dimension_semantics=("parallel",),
            vmem_limit_bytes=vmem_limit_bytes,
        ),
        cost_estimate=pl.CostEstimate(
            flops=int(8 * B * C * max(1, Cr)),
            transcendentals=int(B * C),
            bytes_accessed=int(B * C * 2 * 4
                               + (w1.size + w2.size) * w1.dtype.itemsize
                               + B * C * elt)),
    )(pooled, w1, w2)

    return attn.reshape(B, C, 1, 1)


def channel_attention_ref(x, w1, w2):
    """Pure-JAX reference mirroring the PyTorch forward (f32 math)."""
    xf = x.astype(jnp.float32)
    avg = jnp.mean(xf, axis=(2, 3))   # (B, C)
    mx = jnp.max(xf, axis=(2, 3))     # (B, C)

    def fc(p):
        return jnp.maximum(p @ w1.T, 0.0) @ w2.T

    return jax.nn.sigmoid(fc(avg) + fc(mx))[:, :, None, None]


# ------------------------------------------------------------------------------- tests


if __name__ == "__main__":
    key = jax.random.PRNGKey(0)
    keys = jax.random.split(key, 5)

    def run_case(name, B, C, H, W, r, dtype, spatial_tile, k, atol):
        kx, k1, k2 = jax.random.split(k, 3)
        Cr = max(1, C // r)
        x = jax.random.normal(kx, (B, C, H, W), dtype=jnp.float32).astype(dtype)
        w1 = jax.random.normal(k1, (Cr, C), dtype=jnp.float32) * 0.1
        w2 = jax.random.normal(k2, (C, Cr), dtype=jnp.float32) * 0.1

        out = jax.block_until_ready(
            channel_attention(x, w1, w2, spatial_tile=spatial_tile))
        ref = channel_attention_ref(x, w1, w2)

        assert out.shape == (B, C, 1, 1), name
        err = float(jnp.max(jnp.abs(out.astype(jnp.float32) - ref)))
        assert err < atol, (name, err)

    # auto tile selection (single spatial tile, static chunk loop)
    run_case("auto_tile_f32",   2, 16, 16, 16, 8, jnp.float32, None, keys[0], 2e-3)
    # forced small tile -> multi-step accumulation across the spatial grid axis
    run_case("multi_tile_f32",  2, 16, 16, 16, 8, jnp.float32, 128,  keys[1], 2e-3)
    # H*W not a multiple of 128 -> ragged last tile, gated in-kernel lane masking
    run_case("ragged_tile_f32", 2, 16, 12, 12, 8, jnp.float32, 128,  keys[2], 2e-3)
    # bf16 input (f32 accumulation), 3 spatial tiles
    run_case("bf16_input",      2, 32, 16, 24, 8, jnp.bfloat16, 128, keys[3], 2e-2)
    # C > 128 -> channel-blocked reduction grid (also exercises B=1 parallelism)
    run_case("channel_blocked", 1, 256, 16, 16, 8, jnp.float32, None, keys[4], 2e-3)

    print("KERNEL_OK")
</pallas_src>

<mosaic_0001>
module attributes {stable_mosaic.version = 11 : i64} {
  func.func @pool_reduce_kernel(%arg0: i32, %arg1: i32, %arg2: i32, %arg3: memref<1x16x256xf32, #tpu.memory_space<vmem>>, %arg4: memref<1x16x2xf32, #tpu.memory_space<vmem>>, %arg5: memref<16x128xf32, #tpu.memory_space<vmem>>, %arg6: memref<16x128xf32, #tpu.memory_space<vmem>>) attributes {dimension_semantics = [#tpu.dimension_semantics<parallel>, #tpu.dimension_semantics<parallel>, #tpu.dimension_semantics<arbitrary>], iteration_bounds = array<i64: 2, 1, 1>, scalar_prefetch = 0 : i64, scratch_operands = 2 : i64, tpu.core_type = #tpu.core_type<tc>, window_params = [{transform_indices = @transform_0, window_bounds = array<i64: 1, 16, 256>}, {transform_indices = @transform_1, window_bounds = array<i64: 1, 16, 2>}]} {
    %c0_i32 = arith.constant 0 : i32
    %0 = arith.cmpi eq, %arg2, %c0_i32 : i32
    %1 = arith.extui %0 : i1 to i32
    %c0_i32_0 = arith.constant 0 : i32
    %2 = arith.cmpi ne, %1, %c0_i32_0 : i32
    scf.if %2 {
      %cst = arith.constant 0.000000e+00 : f32
      %18 = vector.broadcast %cst : f32 to vector<16x128xf32>
      %c0_15 = arith.constant 0 : index
      %c0_16 = arith.constant 0 : index
      %19 = vector.load %arg5[%c0_15, %c0_16] : memref<16x128xf32, #tpu.memory_space<vmem>>, vector<16x128xf32>
      tpu.vector_store %arg5[%c0_15, %c0_16], %18 {strides = array<i32>} : memref<16x128xf32, #tpu.memory_space<vmem>>, vector<16x128xf32>,
      %cst_17 = arith.constant 0xFF800000 : f32
      %20 = vector.broadcast %cst_17 : f32 to vector<16x128xf32>
      %c0_18 = arith.constant 0 : index
      %c0_19 = arith.constant 0 : index
      %21 = vector.load %arg6[%c0_18, %c0_19] : memref<16x128xf32, #tpu.memory_space<vmem>>, vector<16x128xf32>
      tpu.vector_store %arg6[%c0_18, %c0_19], %20 {strides = array<i32>} : memref<16x128xf32, #tpu.memory_space<vmem>>, vector<16x128xf32>,
    } else {
    }
    %c0 = arith.constant 0 : index
    %c0_1 = arith.constant 0 : index
    %3 = vector.load %arg5[%c0, %c0_1] : memref<16x128xf32, #tpu.memory_space<vmem>>, vector<16x128xf32>
    %c0_2 = arith.constant 0 : index
    %c0_3 = arith.constant 0 : index
    %4 = vector.load %arg6[%c0_2, %c0_3] : memref<16x128xf32, #tpu.memory_space<vmem>>, vector<16x128xf32>
    %c0_4 = arith.constant 0 : index
    %c0_5 = arith.constant 0 : index
    %c0_6 = arith.constant 0 : index
    %5 = vector.load %arg3[%c0_4, %c0_5, %c0_6] : memref<1x16x256xf32, #tpu.memory_space<vmem>>, vector<1x16x128xf32>
    %6 = vector.shape_cast %5 : vector<1x16x128xf32> to vector<16x128xf32>
    %7 = arith.addf %3, %6 : vector<16x128xf32>
    %8 = arith.maximumf %4, %6 : vector<16x128xf32>
    %c0_7 = arith.constant 0 : index
    %c0_8 = arith.constant 0 : index
    %c128 = arith.constant 128 : index
    %9 = vector.load %arg3[%c0_7, %c0_8, %c128] : memref<1x16x256xf32, #tpu.memory_space<vmem>>, vector<1x16x128xf32>
    %10 = vector.shape_cast %9 : vector<1x16x128xf32> to vector<16x128xf32>
    %11 = arith.addf %7, %10 : vector<16x128xf32>
    %12 = arith.maximumf %8, %10 : vector<16x128xf32>
    %c0_9 = arith.constant 0 : index
    %c0_10 = arith.constant 0 : index
    %13 = vector.load %arg5[%c0_9, %c0_10] : memref<16x128xf32, #tpu.memory_space<vmem>>, vector<16x128xf32>
    tpu.vector_store %arg5[%c0_9, %c0_10], %11 {strides = array<i32>} : memref<16x128xf32, #tpu.memory_space<vmem>>, vector<16x128xf32>,
    %c0_11 = arith.constant 0 : index
    %c0_12 = arith.constant 0 : index
    %14 = vector.load %arg6[%c0_11, %c0_12] : memref<16x128xf32, #tpu.memory_space<vmem>>, vector<16x128xf32>
    tpu.vector_store %arg6[%c0_11, %c0_12], %12 {strides = array<i32>} : memref<16x128xf32, #tpu.memory_space<vmem>>, vector<16x128xf32>,
    %c0_i32_13 = arith.constant 0 : i32
    %15 = arith.cmpi eq, %arg2, %c0_i32_13 : i32
    %16 = arith.extui %15 : i1 to i32
    %c0_i32_14 = arith.constant 0 : i32
    %17 = arith.cmpi ne, %16, %c0_i32_14 : i32
    scf.if %17 {
      %c0_15 = arith.constant 0 : index
      %c0_16 = arith.constant 0 : index
      %18 = vector.load %arg5[%c0_15, %c0_16] : memref<16x128xf32, #tpu.memory_space<vmem>>, vector<16x128xf32>
      %cst = arith.constant dense<0.000000e+00> : vector<16xf32>
      %19 = vector.multi_reduction <add>, %18, %cst [1] : vector<16x128xf32> to vector<16xf32>
      %20 = vector.shape_cast %19 : vector<16xf32> to vector<16x1xf32>
      %cst_17 = arith.constant 3.906250e-03 : f32
      %21 = vector.broadcast %cst_17 : f32 to vector<16x1xf32>
      %22 = arith.mulf %20, %21 : vector<16x1xf32>
      %c0_18 = arith.constant 0 : index
      %c0_19 = arith.constant 0 : index
      %23 = vector.load %arg6[%c0_18, %c0_19] : memref<16x128xf32, #tpu.memory_space<vmem>>, vector<16x128xf32>
      %cst_20 = arith.constant dense<0xFF800000> : vector<16xf32>
      %24 = vector.multi_reduction <maximumf>, %23, %cst_20 [1] : vector<16x128xf32> to vector<16xf32>
      %25 = vector.shape_cast %24 : vector<16xf32> to vector<16x1xf32>
      %26 = tpu.iota {dimensions = array<i32: 1>} : vector<16x2xi32>
      %c0_i32_21 = arith.constant 0 : i32
      %27 = vector.broadcast %c0_i32_21 : i32 to vector<16x2xi32>
      %28 = arith.cmpi eq, %26, %27 : vector<16x2xi32>
      %29 = vector.shape_cast %22 : vector<16x1xf32> to vector<16x1xf32>
      %30 = vector.broadcast %29 : vector<16x1xf32> to vector<16x2xf32>
      %31 = vector.shape_cast %25 : vector<16x1xf32> to vector<16x1xf32>
      %32 = vector.broadcast %31 : vector<16x1xf32> to vector<16x2xf32>
      %33 = arith.select %28, %30, %32 : vector<16x2xi1>, vector<16x2xf32>
      %c0_22 = arith.constant 0 : index
      %c0_23 = arith.constant 0 : index
      %c0_24 = arith.constant 0 : index
      %34 = vector.load %arg4[%c0_22, %c0_23, %c0_24] : memref<1x16x2xf32, #tpu.memory_space<vmem>>, vector<1x16x2xf32>
      %35 = vector.shape_cast %34 : vector<1x16x2xf32> to vector<16x2xf32>
      %36 = vector.shape_cast %33 : vector<16x2xf32> to vector<1x16x2xf32>
      tpu.vector_store %arg4[%c0_22, %c0_23, %c0_24], %36 {strides = array<i32>} : memref<1x16x2xf32, #tpu.memory_space<vmem>>, vector<1x16x2xf32>,
    } else {
    }
    return
  }
  func.func @transform_0(%arg0: i32, %arg1: i32, %arg2: i32) -> (i32, i32, i32) {
    %c0_i32 = arith.constant 0 : i32
    return %arg0, %arg1, %arg2 : i32, i32, i32
  }
  func.func @transform_1(%arg0: i32, %arg1: i32, %arg2: i32) -> (i32, i32, i32) {
    %c0_i32 = arith.constant 0 : i32
    %c0_i32_0 = arith.constant 0 : i32
    return %arg0, %arg1, %c0_i32 : i32, i32, i32
  }
}

</mosaic_0001>

<bundles_post_ra>
// kernel: tpu_custom_call.1
= control target key start
LH: loop header
LB: loop body
LE: loop exit
PB: predicated region body
PF: predicated region fallthrough
CT: control target
= control target key end

     0   :  { %6 = vsyncpa [#allocation5], 0  ;;  %s592_s0 = inlined_call_operand.hbm [shape: f32[2,16,256], index: 0, kind: input, shape index: {}]   ;;  %s593_s1 = inlined_call_operand.vmem [shape: f32[2,16,2], index: 1, kind: output, shape index: {}]  }
   0x1   :  { %8 = vsyncpa [#allocation5 + $0x1], 0  ;;  %s496_s6 = smov 0   ;;  %s498_s7 = smov 0  }
   0x2   :  { %s500_s8 = smov 0   ;;  %s502_s9 = smov 0  }
   0x3   :  { %s504_s10 = smov 0   ;;  %s506_s11 = smov 0  }
   0x4 LB: > { %s331_s12 = sadd.s32 4294967295, %s481_s11   ;;  %s33_s13 = sadd.s32 1, %s477_s10  ;;  %s481_s11 = sphi %s506_s11, %s14_s11   ;;  %s477_s10 = sphi %s504_s10, %s601_s10   ;;  %s473_s9 = sphi %s502_s9, %s600_s9   ;;  %s469_s8 = sphi %s500_s8, %s599_s8   ;;  %s465_s7 = sphi %s498_s7, %s598_s7   ;;  %s461_s6 = sphi %s496_s6, %s597_s6  }
   0x5   : > { %p35_p0 = scmp.ge.s32.totalorder %s33_s13, 2  ;;  %s44_s14 = sadd.s32 1, %s469_s8 }
   0x6   : > { %p51_p1 = scmp.ne.s32.totalorder %s469_s8, %s465_s7  ;;  %p52_p2 = scmp.eq.s32.totalorder %s481_s11, 0 }
   0x7   : > { %s603_s13 = smov (%p35_p0, %s33_s13), 0  ;;  %p57_p4 = scmp.ne.s32.totalorder %s465_s7, %s461_s6 }
   0x8   : > { %p532_p3 = por %p52_p2, %p51_p1  ;;  %s37_s16 = ssub.s32 %s477_s10, %s603_s13 }
   0x9   : > { %p58_p5 = scmp.eq.s32.totalorder %s331_s12, 0  ;;  %p42_p6 = scmp.eq.s32.totalorder %s37_s16, 0 }
   0xa   : > { %p352_p8 = scmp.lt.s32.totalorder %s481_s11, 2  ;;  %s109_s19 = sand.u32 1, %s469_s8  }
   0xb   : > { %p539_p7 = por %p58_p5, %p57_p4  ;;  %s344_s20 = sshll.u32 %s477_s10, 9 }
   0xc   : > { %s545_s18 = scalar_select %p42_p6, %s469_s8, %s44_s14  }
   0xd   : > { %s335_s21 = sshll.u32 %s109_s19, 5  ;;  %s124_s24 = scalar_lea.hbm %s592_s0, %s344_s20 }
   0xe   : > { %s113_s25 = scalar_lea.vmem [#allocation4], %s335_s21  ;;  %p554_p9 = pnand %p352_p8, %p532_p3 }
   0xf   : > { %s125_s26 = sshll.u32 %s113_s25, 4  ;;  %s110_s28 = scalar_lea.sflag [#allocation5], %s109_s19  ;;  %s126_s26 = int_to_ptr.vmem [resolvable:$true] %s125_s26 }
  0x10   : > { %p405_p10 = pneg %p554_p9  ;;  %s416_s29 = scalar_lea.vmem %s126_s26, 512 }
  0x11   : > { %p417_p11 = scmp.ne.s32.totalorder %s126_s26, %s416_s29  ;;  %s483_s30 = smov [#allocation4]  }
  0x12   : > { %s421_s2 = sshll.u32 %s483_s30, 4  ;;  %s422_s2 = int_to_ptr.vmem [resolvable:$false] %s421_s2 }
  0x13   : > { %p419_p12 = pnand %p417_p11, %p405_p10  ;;  %s423_s3 = scalar_lea.vmem %s422_s2, 1024 }
  0x14   : > { %p424_p0 = scmp.lt.s32.totalorder %s126_s26, %s422_s2  ;;  %p425_p1 = scmp.lt.s32.totalorder %s423_s3, %s416_s29 }
  0x15   : > { %p420_p13 = pneg %p419_p12 }
  0x16   : > { %p426_p2 = por %p425_p1, %p424_p0 }
  0x18   : > { %p427_p3 = pnand %p426_p2, %p420_p13 }
  0x1a   : > { %430 = shalt.err (!%p427_p3)
}
  0x1b   : > { %s484_s4 = smov 256   ;;  %s485_s5 = smov 16  }
  0x1c   : > { %351 = dma.hbm_to_vmem [thread:$0]  (!%p554_p9), %s124_s24, 512, %s126_s26, %s110_s28, %s484_s4, %s484_s4, %s485_s5  }
  0x1d   : > { %p338_p4 = scmp.ge.s32.totalorder %s481_s11, 1  ;;  %p133_p5 = scmp.lt.s32.totalorder %s481_s11, 3 }
  0x1f   : > { %p134_p6 = pnand %p338_p4, %p133_p5 }
  0x20   : > { %s139_s6 = sand.u32 (!%p134_p6), 1, %s465_s7  }
  0x21   : > { %137 = sbr.rel (%p134_p6) target bundleno = 188 (0xbc), region = 24  ;;  %s339_s12 = sshll.u32 (!%p134_p6), %s139_s6, 5 }
  0x22   : > { %s140_s14 = scalar_lea.sflag (!%p134_p6), [#allocation5], %s139_s6  ;;  %s143_s15 = scalar_lea.vmem (!%p134_p6), [#allocation4], %s339_s12 }
  0x26   : > { %456 = dma.done.wait (%p539_p7), %s140_s14, 512  }
  0x27   : > { %458 = vsyncadd (%p539_p7), %s140_s14, 4294966784  ;;  %v190_v0 = vld [vmem:[%s143_s15] sm:$0xff]  ;;  %v196_v1 = vld [vmem:[%s143_s15 + $0x8] sm:$0xff]  ;;  %p169_p8 = scmp.lt.s32.totalorder %s473_s9, 1  ;;  %v223_v8 = vlaneseq  ;;  %vm228_vm1 = vcmask 15360  }
  0x28   : > { %v191_v2 = vld [vmem:[%s143_s15 + $0x10] sm:$0xff]  ;;  %v198_v3 = vadd.f32 %v196_v1, %v190_v0  ;;  %v200_v4 = vmax.f32 %v190_v0, %v196_v1  ;;  %v197_v5 = vld [vmem:[%s143_s15 + $0x18] sm:$0xff] }
  0x29   : > { %v199_v6 = vadd.f32 %v197_v5, %v191_v2  ;;  %v201_v7 = vmax.f32 %v191_v2, %v197_v5  ;;  %s605_s9 = smov (!%p169_p8, %s473_s9), 1  ;;  %v224_v9 = vand.u32 127, %v223_v8 }
  0x2a   : > { %211 = vadd.xlane.f32.xlu0 %v198_v3  ;;  %219 = vmax.xlane.f32.xlu1 %v200_v4  ;;  %s345_s16 = sshll.u32 %s605_s9, 4 }
  0x2b   : > { %vm225_vm0 = vcmp.eq.s32.totalorder %v224_v9, 0  ;;  %s176_s20 = scalar_lea.vmem %s593_s1, %s345_s16 }
  0x2e   : > { %213 = vadd.xlane.f32.xlu0 %v199_v6  ;;  %221 = vmax.xlane.f32.xlu1 %v201_v7 }
  0xb3   : > { %v212_v10 = vpop.xlane.xlu0 %211  ;;  %v220_v11 = vpop.xlane.xlu1 %219 }
  0xb4   : > { %v215_v12 = vmul.f32 0.00390625, %v212_v10 }
  0xb6   : > { %v226_v13 = vsel %vm225_vm0, %v215_v12, %v220_v11 }
  0xb7   : > { %229 = vst.msk [vmem:[%s176_s20] sm:$0xff] %vm228_vm1, %v226_v13  ;;  %v214_v14 = vpop.xlane.xlu0 %213  ;;  %v222_v15 = vpop.xlane.xlu1 %221 }
  0xb8   : > { %v216_v16 = vmul.f32 0.00390625, %v214_v14 }
  0xba   : > { %v227_v17 = vsel %vm225_vm0, %v216_v16, %v222_v15 }
  0xbb   : > { %230 = vst.msk [vmem:[%s176_s20 + $0x8] sm:$0xff] %vm228_vm1, %v227_v17 }
  0xbc PF: > { %s14_s11 = sadd.s32 1, %s481_s11   ;;  %s597_s6 = smov %s465_s7 }
  0xbd   : > { %p11_p7 = scmp.ge.s32.totalorder %s14_s11, 4   ;;  %s598_s7 = smov %s469_s8 }
  0xbe   : > { %s599_s8 = smov %s545_s18  ;;  %s600_s9 = smov %s477_s10 }
  0xbf   : > { %s601_s10 = smov %s603_s13  ;;  %13 = sbr.rel (!%p11_p7) target bundleno = 4 (0x4), region = 72 }
  0xc4   :  { %261 = vsyncpa [#allocation5], 1 }
  0xc5   :  { %263 = vsyncpa [#allocation5 + $0x1], 1 }

</bundles_post_ra>
